<compile_context>
chip_gen: v6e
topology: v6e:2x2x1
jax: 0.10.0
libtpu: 0.0.40
codegen_flags: <defaults>
</compile_context>

<pallas_src>
import functools
import math

import jax
import jax.numpy as jnp
from jax.experimental import pallas as pl
from jax.experimental.pallas import tpu as pltpu


def _round_up(v, m):
    return (v + m - 1) // m * m


# -----------------------------------------------------------------------------
# One-time parameter preparation (hoisted out of the per-call wrapper).
# -----------------------------------------------------------------------------
def prepare_mlp_params(weights, biases, *, compute_dtype=jnp.bfloat16, lane=128):
    """Pad hidden/output dims to 128 lanes and cast weights to compute_dtype.

    weights[i]: (dims[i], dims[i+1])   (transposed vs. PyTorch nn.Linear)
    biases[i]:  (1, dims[i+1])

    Layer-0's K dim is kept at the true d_in (x is never feature-padded).
    Zero padding is exact: padded weight rows/cols and biases are 0 and
    silu(0) == 0, so padded activation columns stay exactly 0 through depth.
    """
    dims = [weights[0].shape[0]] + [w.shape[1] for w in weights]
    pdims = [dims[0]] + [_round_up(d, lane) for d in dims[1:]]
    pw, pb = [], []
    for li, (w, b) in enumerate(zip(weights, biases)):
        wp = jnp.pad(w, ((0, pdims[li] - w.shape[0]),
                         (0, pdims[li + 1] - w.shape[1]))).astype(compute_dtype)
        bp = jnp.pad(b, ((0, 0),
                         (0, pdims[li + 1] - b.shape[1]))).astype(jnp.float32)
        pw.append(wp)
        pb.append(bp)
    return pw, pb, dims, pdims


# -----------------------------------------------------------------------------
# Kernel: whole MLP on one row tile.
# -----------------------------------------------------------------------------
def _mlp_kernel(num_layers, activate_last, compute_dtype, approx_recip, *refs):
    # refs = (x_ref, w0, b0, w1, b1, ..., out_ref)
    x_ref = refs[0]
    out_ref = refs[-1]
    params = refs[1:-1]

    h = x_ref[...].astype(compute_dtype)
    for li in range(num_layers):
        w = params[2 * li][...]        # already in compute_dtype (no per-step cast)
        b = params[2 * li + 1][...]    # f32
        # MXU matmul with f32 accumulation; bias add in f32.
        h = jnp.dot(h, w, preferred_element_type=jnp.float32) + b
        is_last = li == num_layers - 1
        if (not is_last) or activate_last:
            # SiLU: x * sigmoid(x); exp + reciprocal go to the EUP slot.
            h = h * pl.reciprocal(1.0 + jnp.exp(-h), approx=approx_recip)
        if not is_last:
            h = h.astype(compute_dtype)  # narrow operands for the next matmul
    out_ref[...] = h.astype(out_ref.dtype)


# -----------------------------------------------------------------------------
# Forward wrapper (expects pre-padded / pre-cast params).
# -----------------------------------------------------------------------------
def mlp_forward(x, padded_weights, padded_biases, d_out, *,
                activate_last=False, tile_m=512, compute_dtype=jnp.bfloat16):
    """x: (N, d_in) with the TRUE (unpadded) d_in; returns (N, d_out)."""
    N, d_in = x.shape
    assert padded_weights[0].shape[0] == d_in
    num_layers = len(padded_weights)
    d_out_p = padded_weights[-1].shape[1]
    approx_recip = compute_dtype != jnp.float32

    # Minimum sublane packing: 8 for 32-bit inputs, 16 for sub-32-bit.
    min_sub = 8 if x.dtype.itemsize >= 4 else 16
    if N > min_sub:
        # At least 2 grid steps so v7x's two TensorCores both get row tiles.
        tile_m_eff = min(tile_m, _round_up(pl.cdiv(N, 2), min_sub))
    else:
        tile_m_eff = _round_up(max(N, 1), min_sub)

    n_pad = _round_up(N, tile_m_eff)
    if n_pad != N:
        x = jnp.pad(x, ((0, n_pad - N), (0, 0)))
    grid = (n_pad // tile_m_eff,)

    kernel = functools.partial(_mlp_kernel, num_layers, activate_last,
                               compute_dtype, approx_recip)

    flat_params = []
    # x block: last dim equals the full array dim -> legal without 128-padding.
    in_specs = [pl.BlockSpec((tile_m_eff, d_in), lambda i: (i, 0))]
    for w, b in zip(padded_weights, padded_biases):
        flat_params.extend([w, b])
        # Constant index_map: fetched once, kept resident across row tiles.
        in_specs.append(pl.BlockSpec(w.shape, lambda i: (0, 0)))
        in_specs.append(pl.BlockSpec(b.shape, lambda i: (0, 0)))
    out_spec = pl.BlockSpec((tile_m_eff, d_out_p), lambda i: (i, 0))

    # VMEM budget: double-buffered x/out tiles + (double-buffered) params.
    est = 2 * tile_m_eff * (d_in + d_out_p) * x.dtype.itemsize
    est += 2 * sum(w.size * w.dtype.itemsize + b.size * b.dtype.itemsize
                   for w, b in zip(padded_weights, padded_biases))
    # Only override the scoped limit when we actually approach v5e's 16 MiB
    # default; cap well under v7x's 64 MiB physical VMEM.
    vmem_limit = None if est < (12 << 20) else int(min(2 * est, 48 << 20))

    out = pl.pallas_call(
        kernel,
        out_shape=jax.ShapeDtypeStruct((n_pad, d_out_p), x.dtype),
        grid=grid,
        in_specs=in_specs,
        out_specs=out_spec,
        compiler_params=pltpu.CompilerParams(
            dimension_semantics=("parallel",),
            vmem_limit_bytes=vmem_limit),
    )(x, *flat_params)

    return out[:N, :d_out]


# -----------------------------------------------------------------------------
# Init + pure-JAX reference (for the correctness check).
# -----------------------------------------------------------------------------
def init_mlp_params(key, dims, *, bias_last=True):
    """nn.Linear-style init: U(-1/sqrt(fan_in), 1/sqrt(fan_in))."""
    weights, biases = [], []
    n_layers = len(dims) - 1
    for i, (in_dim, out_dim) in enumerate(zip(dims[:-1], dims[1:])):
        key, kw, kb = jax.random.split(key, 3)
        bound = 1.0 / math.sqrt(in_dim)
        # PyTorch stores (out, in); we keep the transposed (in, out) layout.
        w = jax.random.uniform(kw, (in_dim, out_dim), jnp.float32, -bound, bound)
        if i == n_layers - 1 and not bias_last:
            b = jnp.zeros((1, out_dim), jnp.float32)
        else:
            b = jax.random.uniform(kb, (1, out_dim), jnp.float32, -bound, bound)
        weights.append(w)
        biases.append(b)
    return weights, biases


def mlp_reference(x, weights, biases, *, activate_last=False):
    h = x
    n = len(weights)
    for i, (w, b) in enumerate(zip(weights, biases)):
        h = h @ w + b
        if i < n - 1 or activate_last:
            h = h * jax.nn.sigmoid(h)
    return h


if __name__ == "__main__":
    # MLP(dims=[32, 64, 64, 32], activation=SiLU, activate_last=False,
    #     bias_last=True, k_linears=1)
    dims = [32, 64, 64, 32]
    N = 64  # rows (e.g. nodes/edges in the EGNN graph)

    key = jax.random.PRNGKey(0)
    key, kx = jax.random.split(key)
    x = jax.random.normal(kx, (N, dims[0]), jnp.float32)
    weights, biases = init_mlp_params(key, dims)

    ref = mlp_reference(x, weights, biases, activate_last=False)

    # f32 MXU operands: tight numerical check vs the reference.
    w32, b32, _, _ = prepare_mlp_params(weights, biases,
                                        compute_dtype=jnp.float32)
    out_f32 = mlp_forward(x, w32, b32, dims[-1], activate_last=False,
                          compute_dtype=jnp.float32)
    out_f32 = jax.block_until_ready(out_f32)
    assert out_f32.shape == (N, dims[-1])
    assert jnp.allclose(out_f32, ref, atol=1e-4, rtol=1e-4)

    # bf16 MXU operands (v6e/v7x fast path), f32 accumulation: relaxed check.
    wbf, bbf, _, _ = prepare_mlp_params(weights, biases,
                                        compute_dtype=jnp.bfloat16)
    out_bf16 = mlp_forward(x, wbf, bbf, dims[-1], activate_last=False,
                           compute_dtype=jnp.bfloat16)
    out_bf16 = jax.block_until_ready(out_bf16)
    assert out_bf16.shape == (N, dims[-1])
    assert jnp.allclose(out_bf16, ref, atol=5e-2, rtol=5e-2)

    print("KERNEL_OK")
</pallas_src>

<mosaic_0001>
module attributes {stable_mosaic.version = 11 : i64} {
  func.func @_mlp_kernel(%arg0: i32, %arg1: memref<32x32xf32, #tpu.memory_space<vmem>>, %arg2: memref<32x128xf32, #tpu.memory_space<vmem>>, %arg3: memref<1x128xf32, #tpu.memory_space<vmem>>, %arg4: memref<128x128xf32, #tpu.memory_space<vmem>>, %arg5: memref<1x128xf32, #tpu.memory_space<vmem>>, %arg6: memref<128x128xf32, #tpu.memory_space<vmem>>, %arg7: memref<1x128xf32, #tpu.memory_space<vmem>>, %arg8: memref<32x128xf32, #tpu.memory_space<vmem>>) attributes {dimension_semantics = [#tpu.dimension_semantics<parallel>], iteration_bounds = array<i64: 2>, scalar_prefetch = 0 : i64, scratch_operands = 0 : i64, tpu.core_type = #tpu.core_type<tc>, window_params = [{transform_indices = @transform_0, window_bounds = array<i64: 32, 32>}, {pipeline_mode = #tpu.pipeline_mode<synchronous>, transform_indices = @transform_1, window_bounds = array<i64: 32, 128>}, {pipeline_mode = #tpu.pipeline_mode<synchronous>, transform_indices = @transform_2, window_bounds = array<i64: 1, 128>}, {pipeline_mode = #tpu.pipeline_mode<synchronous>, transform_indices = @transform_3, window_bounds = array<i64: 128, 128>}, {pipeline_mode = #tpu.pipeline_mode<synchronous>, transform_indices = @transform_4, window_bounds = array<i64: 1, 128>}, {pipeline_mode = #tpu.pipeline_mode<synchronous>, transform_indices = @transform_5, window_bounds = array<i64: 128, 128>}, {pipeline_mode = #tpu.pipeline_mode<synchronous>, transform_indices = @transform_6, window_bounds = array<i64: 1, 128>}, {transform_indices = @transform_7, window_bounds = array<i64: 32, 128>}]} {
    %c0 = arith.constant 0 : index
    %c0_0 = arith.constant 0 : index
    %0 = vector.load %arg1[%c0, %c0_0] : memref<32x32xf32, #tpu.memory_space<vmem>>, vector<32x32xf32>
    %c0_1 = arith.constant 0 : index
    %c0_2 = arith.constant 0 : index
    %1 = vector.load %arg2[%c0_1, %c0_2] : memref<32x128xf32, #tpu.memory_space<vmem>>, vector<32x128xf32>
    %c0_3 = arith.constant 0 : index
    %c0_4 = arith.constant 0 : index
    %2 = vector.load %arg3[%c0_3, %c0_4] : memref<1x128xf32, #tpu.memory_space<vmem>>, vector<1x128xf32>
    %cst = arith.constant dense<0.000000e+00> : vector<32x128xf32>
    %3 = tpu.matmul %0, %1, %cst {dimension_numbers = #tpu.dot_dimension_numbers<[1], [0], [0], [1], [0, 0, 1, 1], [], []>} : vector<32x32xf32>, vector<32x128xf32>, vector<32x128xf32> -> vector<32x128xf32>
    %4 = vector.broadcast %2 : vector<1x128xf32> to vector<32x128xf32>
    %5 = arith.addf %3, %4 : vector<32x128xf32>
    %cst_5 = arith.constant 0.000000e+00 : f32
    %6 = vector.broadcast %cst_5 : f32 to vector<32x128xf32>
    %7 = arith.subf %6, %5 : vector<32x128xf32>
    %8 = math.exp %7 : vector<32x128xf32>
    %cst_6 = arith.constant 1.000000e+00 : f32
    %9 = vector.broadcast %cst_6 : f32 to vector<32x128xf32>
    %10 = arith.addf %9, %8 : vector<32x128xf32>
    %11 = tpu.reciprocal %10 : vector<32x128xf32> -> vector<32x128xf32>
    %12 = arith.mulf %5, %11 : vector<32x128xf32>
    %c0_7 = arith.constant 0 : index
    %c0_8 = arith.constant 0 : index
    %13 = vector.load %arg4[%c0_7, %c0_8] : memref<128x128xf32, #tpu.memory_space<vmem>>, vector<128x128xf32>
    %c0_9 = arith.constant 0 : index
    %c0_10 = arith.constant 0 : index
    %14 = vector.load %arg5[%c0_9, %c0_10] : memref<1x128xf32, #tpu.memory_space<vmem>>, vector<1x128xf32>
    %cst_11 = arith.constant dense<0.000000e+00> : vector<32x128xf32>
    %15 = tpu.matmul %12, %13, %cst_11 {dimension_numbers = #tpu.dot_dimension_numbers<[1], [0], [0], [1], [0, 0, 1, 1], [], []>} : vector<32x128xf32>, vector<128x128xf32>, vector<32x128xf32> -> vector<32x128xf32>
    %16 = vector.broadcast %14 : vector<1x128xf32> to vector<32x128xf32>
    %17 = arith.addf %15, %16 : vector<32x128xf32>
    %cst_12 = arith.constant 0.000000e+00 : f32
    %18 = vector.broadcast %cst_12 : f32 to vector<32x128xf32>
    %19 = arith.subf %18, %17 : vector<32x128xf32>
    %20 = math.exp %19 : vector<32x128xf32>
    %cst_13 = arith.constant 1.000000e+00 : f32
    %21 = vector.broadcast %cst_13 : f32 to vector<32x128xf32>
    %22 = arith.addf %21, %20 : vector<32x128xf32>
    %23 = tpu.reciprocal %22 : vector<32x128xf32> -> vector<32x128xf32>
    %24 = arith.mulf %17, %23 : vector<32x128xf32>
    %c0_14 = arith.constant 0 : index
    %c0_15 = arith.constant 0 : index
    %25 = vector.load %arg6[%c0_14, %c0_15] : memref<128x128xf32, #tpu.memory_space<vmem>>, vector<128x128xf32>
    %c0_16 = arith.constant 0 : index
    %c0_17 = arith.constant 0 : index
    %26 = vector.load %arg7[%c0_16, %c0_17] : memref<1x128xf32, #tpu.memory_space<vmem>>, vector<1x128xf32>
    %cst_18 = arith.constant dense<0.000000e+00> : vector<32x128xf32>
    %27 = tpu.matmul %24, %25, %cst_18 {dimension_numbers = #tpu.dot_dimension_numbers<[1], [0], [0], [1], [0, 0, 1, 1], [], []>} : vector<32x128xf32>, vector<128x128xf32>, vector<32x128xf32> -> vector<32x128xf32>
    %28 = vector.broadcast %26 : vector<1x128xf32> to vector<32x128xf32>
    %29 = arith.addf %27, %28 : vector<32x128xf32>
    %c0_19 = arith.constant 0 : index
    %c0_20 = arith.constant 0 : index
    %30 = vector.load %arg8[%c0_19, %c0_20] : memref<32x128xf32, #tpu.memory_space<vmem>>, vector<32x128xf32>
    tpu.vector_store %arg8[%c0_19, %c0_20], %29 {strides = array<i32>} : memref<32x128xf32, #tpu.memory_space<vmem>>, vector<32x128xf32>,
    return
  }
  func.func @transform_0(%arg0: i32) -> (i32, i32) {
    %c0_i32 = arith.constant 0 : i32
    %c0_i32_0 = arith.constant 0 : i32
    return %arg0, %c0_i32 : i32, i32
  }
  func.func @transform_1(%arg0: i32) -> (i32, i32) {
    %c0_i32 = arith.constant 0 : i32
    %c0_i32_0 = arith.constant 0 : i32
    %c0_i32_1 = arith.constant 0 : i32
    return %c0_i32, %c0_i32_0 : i32, i32
  }
  func.func @transform_2(%arg0: i32) -> (i32, i32) {
    %c0_i32 = arith.constant 0 : i32
    %c0_i32_0 = arith.constant 0 : i32
    %c0_i32_1 = arith.constant 0 : i32
    return %c0_i32, %c0_i32_0 : i32, i32
  }
  func.func @transform_3(%arg0: i32) -> (i32, i32) {
    %c0_i32 = arith.constant 0 : i32
    %c0_i32_0 = arith.constant 0 : i32
    %c0_i32_1 = arith.constant 0 : i32
    return %c0_i32, %c0_i32_0 : i32, i32
  }
  func.func @transform_4(%arg0: i32) -> (i32, i32) {
    %c0_i32 = arith.constant 0 : i32
    %c0_i32_0 = arith.constant 0 : i32
    %c0_i32_1 = arith.constant 0 : i32
    return %c0_i32, %c0_i32_0 : i32, i32
  }
  func.func @transform_5(%arg0: i32) -> (i32, i32) {
    %c0_i32 = arith.constant 0 : i32
    %c0_i32_0 = arith.constant 0 : i32
    %c0_i32_1 = arith.constant 0 : i32
    return %c0_i32, %c0_i32_0 : i32, i32
  }
  func.func @transform_6(%arg0: i32) -> (i32, i32) {
    %c0_i32 = arith.constant 0 : i32
    %c0_i32_0 = arith.constant 0 : i32
    %c0_i32_1 = arith.constant 0 : i32
    return %c0_i32, %c0_i32_0 : i32, i32
  }
  func.func @transform_7(%arg0: i32) -> (i32, i32) {
    %c0_i32 = arith.constant 0 : i32
    %c0_i32_0 = arith.constant 0 : i32
    return %arg0, %c0_i32 : i32, i32
  }
}

</mosaic_0001>

<bundles_post_ra>
// kernel: tpu_custom_call.1
= control target key start
LH: loop header
LB: loop body
LE: loop exit
PB: predicated region body
PF: predicated region fallthrough
CT: control target
= control target key end

     0   :  { %12 = vsyncpa [#allocation3], 0  ;;  %s1383_s0 = inlined_call_operand.vmem [shape: f32[64,32], index: 0, kind: input, shape index: {}]   ;;  %s1384_s1 = inlined_call_operand.vmem [shape: f32[32,128], index: 1, kind: input, shape index: {}]   ;;  %s1385_s2 = inlined_call_operand.vmem [shape: f32[1,128], index: 2, kind: input, shape index: {}]   ;;  %s1386_s3 = inlined_call_operand.hbm [shape: f32[128,128], index: 3, kind: input, shape index: {}]   ;;  %s1387_s4 = inlined_call_operand.vmem [shape: f32[1,128], index: 4, kind: input, shape index: {}]   ;;  %s1388_s5 = inlined_call_operand.hbm [shape: f32[128,128], index: 5, kind: input, shape index: {}]   ;;  %s1389_s6 = inlined_call_operand.vmem [shape: f32[1,128], index: 6, kind: input, shape index: {}]   ;;  %s1390_s7 = inlined_call_operand.hbm [shape: f32[64,128], index: 7, kind: output, shape index: {}]  }
   0x1   :  { %13 = vsyncpa [#allocation6], 0 }
   0x2   :  { %14 = vsyncpa [#allocation4], 0 }
   0x3   :  { %16 = vsyncpa [#allocation4 + $0x1], 0  ;;  %s1216_s24 = smov 0   ;;  %s1218_s25 = smov 0  }
   0x4   :  { %s1220_s26 = smov 0   ;;  %s1222_s27 = smov 0  }
   0x5 LB: > { %s1237_s28 = sadd.s32 4294967295, %s1167_s27   ;;  %s789_s29 = sadd.s32 4294967294, %s1167_s27   ;;  %s1167_s27 = sphi %s1222_s27, %s1404_s27   ;;  %s1163_s26 = sphi %s1220_s26, %s1403_s26   ;;  %s1159_s25 = sphi %s1218_s25, %s1402_s25   ;;  %s1155_s24 = sphi %s1216_s24, %s1401_s24  }
   0x6   : > { %s1241_s30 = sadd.s32 1, %s1167_s27   ;;  %s181_s8 = sadd.s32 1, %s1163_s26 }
   0x7   : > { %s178_s9 = ssub.s32 %s1167_s27, %s1241_s30  ;;  %p191_p0 = scmp.ne.s32.totalorder %s1163_s26, %s1159_s25 }
   0x8   : > { %p179_p1 = scmp.eq.s32.totalorder %s178_s9, 0  ;;  %p192_p2 = scmp.eq.s32.totalorder %s1237_s28, 1 }
   0x9   : > { %p197_p3 = scmp.ne.s32.totalorder %s1159_s25, %s1155_s24  ;;  %p198_p4 = scmp.eq.s32.totalorder %s789_s29, 1 }
   0xa   : > { %s1252_s10 = scalar_select %p179_p1, %s1163_s26, %s181_s8  }
   0xb   : > { %p1254_p5 = por %p192_p2, %p191_p0  ;;  %p1258_p6 = por %p198_p4, %p197_p3 }
   0xc   : > { %p790_p7 = scmp.ge.s32.totalorder %s1167_s27, 1  ;;  %p205_p8 = scmp.lt.s32.totalorder %s1167_s27, 3 }
   0xd   : > { %s1393_s12 = scalar_select %p1258_p6, 1, 0 }
   0xe   : > { %p1391_p9 = scmp.eq.s32.totalorder %s1237_s28, 0  ;;  %p1265_p10 = pnand %p790_p7, %p205_p8 }
   0xf   : > { %s1169_s14 = smov [#allocation2]   ;;  %s1170_s17 = smov [#allocation5]  }
  0x10   : > { %s223_s15 = sshll.u32 %s1169_s14, 4  ;;  %p961_p11 = pneg %p1265_p10  ;;  %s224_s15 = int_to_ptr.vmem [resolvable:$true] %s223_s15 }
  0x11   : > { %s239_s18 = sshll.u32 %s1170_s17, 4  ;;  %s1058_s19 = scalar_lea.vmem %s224_s15, 2048  ;;  %s240_s18 = int_to_ptr.vmem [resolvable:$true] %s239_s18 }
  0x12   : > { %p1273_p12 = pnand %p1391_p9, %p961_p11  ;;  %p1059_p0 = scmp.ne.s32.totalorder %s224_s15, %s1058_s19 }
  0x13   : > { %p1066_p3 = scmp.lt.s32.totalorder %s224_s15, %s224_s15  ;;  %p1067_p4 = scmp.lt.s32.totalorder %s1058_s19, %s1058_s19 }
  0x14   : > { %p1049_p13 = pneg %p1273_p12 }
  0x15   : > { %p1068_p7 = por %p1067_p4, %p1066_p3 }
  0x16   : > { %p1061_p1 = pnand %p1059_p0, %p1049_p13 }
  0x18   : > { %p1062_p2 = pneg %p1061_p1 }
  0x1a   : > { %p1069_p8 = pnand %p1068_p7, %p1062_p2 }
  0x1c   : > { %1072 = shalt.err (!%p1069_p8)
}
  0x1d   : > { %s1171_s20 = smov 128   ;;  %s1172_s21 = smov 8  }
  0x1e   : > { %964 = dma.hbm_to_vmem [thread:$0]  (!%p1273_p12), %s1386_s3, 2048, %s224_s15, [#allocation3], %s1171_s20, %s1171_s20, %s1172_s21  }
  0x1f   : > { %s1084_s29 = scalar_lea.vmem %s240_s18, 2048  ;;  %p1092_p9 = scmp.lt.s32.totalorder %s240_s18, %s240_s18 }
  0x20   : > { %p1085_p11 = scmp.ne.s32.totalorder %s240_s18, %s1084_s29  ;;  %p1093_p6 = scmp.lt.s32.totalorder %s1084_s29, %s1084_s29 }
  0x22   : > { %p1087_p0 = pnand %p1085_p11, %p1049_p13  ;;  %p1094_p3 = por %p1093_p6, %p1092_p9 }
  0x24   : > { %p1088_p1 = pneg %p1087_p0 }
  0x26   : > { %p1095_p2 = pnand %p1094_p3, %p1088_p1 }
  0x28   : > { %1098 = shalt.err (!%p1095_p2)
}
  0x29   : > { %967 = dma.hbm_to_vmem [thread:$0]  (!%p1273_p12), %s1388_s5, 2048, %s240_s18, [#allocation6], %s1171_s20, %s1171_s20, %s1172_s21  }
  0x2a   : > { %267 = sbr.rel (%p1265_p10) target bundleno = 743 (0x2e7), region = 48  ;;  %p1396_p4 = scmp.eq.s32.totalorder (!%p1265_p10), %s1237_s28, 0 }
  0x2f   : > { %1142 = dma.done.wait (%p1396_p4), [#allocation3], 2048   ;;  %p1397_p13 = pmov %p1396_p4 }
  0x30   : > { %p1398_p7 = pmov %p1396_p4 }
  0x31   : > { %1144 = vsyncadd (%p1397_p13), [#allocation3], 4294965248 }
  0x32   : > { %1146 = dma.done.wait (%p1398_p7), [#allocation6], 2048   ;;  %p1399_p6 = pmov %p1396_p4 }
  0x33   : > { %s798_s14 = sshll.u32 %s1237_s28, 2  ;;  %vm325_vm0 = vcmask 261120   ;;  %v317_v0 = vld [vmem:[%s1384_s1 + $0x18] sm:$0xff]  ;;  %v316_v1 = vld [vmem:[%s1384_s1 + $0x10] sm:$0xff]  ;;  %v315_v3 = vld [vmem:[%s1384_s1 + $0x8] sm:$0xff]  ;;  %s300_s13 = sand.u32 1, %s1159_s25  }
  0x34   : > { %1148 = vsyncadd (%p1399_p6), [#allocation6], 4294965248  ;;  %p304_p9 = scmp.lt.s32.totalorder %s798_s14, 7  ;;  %861 = vmatprep.subr.mxu0 %v317_v0  ;;  %v314_v4 = vld [vmem:[%s1384_s1] sm:$0xff]  ;;  %v462_v8 = vld [vmem:[#allocation2 + $0x78] sm:$0xff]  ;;  %s812_s22 = sshll.u32 %s1237_s28, 9 }
  0x35   : > { %862 = vmatpush3.msra.mxu0 %v317_v0  ;;  %875 = vmatprep.subr.mxu1 %v462_v8  ;;  %v461_v9 = vld [vmem:[#allocation2 + $0x70] sm:$0xff]  ;;  %v460_v10 = vld [vmem:[#allocation2 + $0x68] sm:$0xff]  ;;  %v459_v11 = vld [vmem:[#allocation2 + $0x60] sm:$0xff]  ;;  %s1341_s8 = scalar_lea.hbm %s1390_s7, %s812_s22  ;;  %s1343_s9 = scalar_lea.sflag [#allocation4], %s300_s13 }
  0x36   : > { %s1406_s14 = smov (!%p304_p9, %s798_s14), 7  ;;  %863 = vmatprep.subr.mxu0 %v316_v1  ;;  %876 = vmatpush3.msra.mxu1 %v462_v8  ;;  %v458_v12 = vld [vmem:[#allocation2 + $0x58] sm:$0xff]  ;;  %v457_v13 = vld [vmem:[#allocation2 + $0x50] sm:$0xff]  ;;  %v456_v14 = vld [vmem:[#allocation2 + $0x48] sm:$0xff] }
  0x37   : > { %s799_s15 = sshll.u32 %s1406_s14, 3  ;;  %864 = vmatpush3.msra.mxu0 %v316_v1  ;;  %877 = vmatprep.subr.mxu1 %v461_v9  ;;  %v455_v15 = vld [vmem:[#allocation2 + $0x40] sm:$0xff]  ;;  %v454_v16 = vld [vmem:[#allocation2 + $0x38] sm:$0xff]  ;;  %v453_v17 = vld [vmem:[#allocation2 + $0x30] sm:$0xff]  ;;  %s1173_s14 = smov [#allocation7]  }
  0x38   : > { %s307_s17 = scalar_lea.vmem %s1383_s0, %s799_s15  ;;  %865 = vmatprep.subr.mxu0 %v315_v3  ;;  %878 = vmatpush3.msra.mxu1 %v461_v9  ;;  %v452_v18 = vld [vmem:[#allocation2 + $0x28] sm:$0xff]  ;;  %v451_v19 = vld [vmem:[#allocation2 + $0x20] sm:$0xff]  ;;  %v450_v20 = vld [vmem:[#allocation2 + $0x18] sm:$0xff]  ;;  %s1103_s15 = sshll.u32 %s1173_s14, 4  ;;  %s1104_s15 = int_to_ptr.vmem [resolvable:$false] %s1103_s15 }
  0x39   : > { %v310_v2 = vld [vmem:[%s307_s17] sm:$0xff]  ;;  %866 = vmatpush3.msra.mxu0 %v315_v3  ;;  %v311_v5 = vld [vmem:[%s307_s17 + $0x8] sm:$0xff]  ;;  %v312_v6 = vld [vmem:[%s307_s17 + $0x10] sm:$0xff]  ;;  %879 = vmatprep.subr.mxu1 %v460_v10  ;;  %s1105_s16 = scalar_lea.vmem %s1104_s15, 1024 }
  0x3a   : > { %869 = vmatprep.mubr.msk.f32.mxu0 %vm325_vm0, %v310_v2  ;;  %867 = vmatprep.subr.mxu0 %v314_v4  ;;  %v313_v7 = vld [vmem:[%s307_s17 + $0x18] sm:$0xff]  ;;  %v449_v21 = vld [vmem:[#allocation2 + $0x10] sm:$0xff]  ;;  %v448_v22 = vld [vmem:[#allocation2 + $0x8] sm:$0xff]  ;;  %s797_s17 = sshll.u32 %s300_s13, 5 }
  0x3b   : > { %868 = vmatpush3.msra.mxu0 %v314_v4  ;;  %880 = vmatpush3.msra.mxu1 %v460_v10  ;;  %v447_v23 = vld [vmem:[#allocation2] sm:$0xff]  ;;  %v594_v57 = vld [vmem:[#allocation5 + $0x78] sm:$0xff]  ;;  %v593_v58 = vld [vmem:[#allocation5 + $0x70] sm:$0xff]  ;;  %s302_s20 = scalar_lea.vmem [#allocation7], %s797_s17 }
  0x3c   : > { %870 = vmatmul.mubr.msk.f32.vlgmr.msra.gmra.mxu0 %vm325_vm0, %v311_v5  ;;  %881 = vmatprep.subr.mxu1 %v459_v11  ;;  %v800_v24 = vld [vmem:[%s1385_s2] ss:$0 sm:$0xff]  ;;  %v592_v59 = vld [vmem:[#allocation5 + $0x68] sm:$0xff]  ;;  %v590_v61 = vld [vmem:[#allocation5 + $0x58] sm:$0xff]  ;;  %s705_s21 = sshll.u32 %s302_s20, 4  ;;  %s1336_s21 = int_to_ptr.vmem [resolvable:$true] %s705_s21 }
  0x3d   : > { %872 = vmatprep.mubr.msk.f32.mxu0 %vm325_vm0, %v312_v6  ;;  %882 = vmatpush3.msra.mxu1 %v459_v11  ;;  %v591_v60 = vld [vmem:[#allocation5 + $0x60] sm:$0xff]  ;;  %v589_v62 = vld [vmem:[#allocation5 + $0x50] sm:$0xff]  ;;  %v588_v63 = vld [vmem:[#allocation5 + $0x48] sm:$0xff]  ;;  %s1099_s28 = scalar_lea.vmem %s1336_s21, 512  ;;  %p1106_p11 = scmp.lt.s32.totalorder %s1336_s21, %s1104_s15 }
  0x3e   : > { %883 = vmatprep.subr.mxu1 %v458_v12  ;;  %913 = vmatprep.subr.mxu0 %v594_v57  ;;  %v587_v0 = vld [vmem:[#allocation5 + $0x40] sm:$0xff]  ;;  %v586_v1 = vld [vmem:[#allocation5 + $0x38] sm:$0xff]  ;;  %v585_v2 = vld [vmem:[#allocation5 + $0x30] sm:$0xff]  ;;  %p1100_p10 = scmp.ne.s32.totalorder %s1336_s21, %s1099_s28  ;;  %p1107_p0 = scmp.lt.s32.totalorder %s1105_s16, %s1099_s28 }
  0x3f   : > { %884 = vmatpush3.msra.mxu1 %v458_v12  ;;  %914 = vmatpush3.msra.mxu0 %v594_v57  ;;  %v584_v3 = vld [vmem:[#allocation5 + $0x28] sm:$0xff]  ;;  %v583_v4 = vld [vmem:[#allocation5 + $0x20] sm:$0xff]  ;;  %v582_v5 = vld [vmem:[#allocation5 + $0x18] sm:$0xff] }
  0x40   : > { %873 = vmatmul.mubr.msk.f32.gmra.mxu0 %vm325_vm0, %v313_v7  ;;  %885 = vmatprep.subr.mxu1 %v457_v13  ;;  %v581_v6 = vld [vmem:[#allocation5 + $0x10] sm:$0xff]  ;;  %v580_v7 = vld [vmem:[#allocation5 + $0x8] sm:$0xff]  ;;  %v579_v8 = vld [vmem:[#allocation5] sm:$0xff]  ;;  %p1101_p12 = pnand %p1100_p10, %p1254_p5  ;;  %p1108_p1 = por %p1107_p0, %p1106_p11 }
  0x41   : > { %886 = vmatpush3.msra.mxu1 %v457_v13  ;;  %915 = vmatprep.subr.mxu0 %v593_v58  ;;  %v805_v9 = vld [vmem:[%s1387_s4] ss:$0 sm:$0xff] }
  0x42   : > { %887 = vmatprep.subr.mxu1 %v456_v14  ;;  %916 = vmatpush3.msra.mxu0 %v593_v58  ;;  %p1102_p8 = pneg %p1101_p12 }
  0x43   : > { %888 = vmatpush3.msra.mxu1 %v456_v14  ;;  %917 = vmatprep.subr.mxu0 %v592_v59 }
  0x44   : > { %889 = vmatprep.subr.mxu1 %v455_v15  ;;  %918 = vmatpush3.msra.mxu0 %v592_v59  ;;  %p1109_p3 = pnand %p1108_p1, %p1102_p8 }
  0x45   : > { %890 = vmatpush3.msra.mxu1 %v455_v15  ;;  %919 = vmatprep.subr.mxu0 %v591_v60 }
  0x46   : > { %891 = vmatprep.subr.mxu1 %v454_v16  ;;  %920 = vmatpush3.msra.mxu0 %v591_v60 }
  0x47   : > { %892 = vmatpush3.msra.mxu1 %v454_v16  ;;  %921 = vmatprep.subr.mxu0 %v590_v61 }
  0x48   : > { %893 = vmatprep.subr.mxu1 %v453_v17  ;;  %922 = vmatpush3.msra.mxu0 %v590_v61 }
  0x49   : > { %894 = vmatpush3.msra.mxu1 %v453_v17  ;;  %923 = vmatprep.subr.mxu0 %v589_v62 }
  0x4a   : > { %895 = vmatprep.subr.mxu1 %v452_v18  ;;  %924 = vmatpush3.msra.mxu0 %v589_v62 }
  0x4b   : > { %896 = vmatpush3.msra.mxu1 %v452_v18  ;;  %925 = vmatprep.subr.mxu0 %v588_v63 }
  0x4c   : > { %897 = vmatprep.subr.mxu1 %v451_v19  ;;  %926 = vmatpush3.msra.mxu0 %v588_v63 }
  0x4d   : > { %898 = vmatpush3.msra.mxu1 %v451_v19  ;;  %927 = vmatprep.subr.mxu0 %v587_v0 }
  0x4e   : > { %899 = vmatprep.subr.mxu1 %v450_v20  ;;  %928 = vmatpush3.msra.mxu0 %v587_v0 }
  0x4f   : > { %900 = vmatpush3.msra.mxu1 %v450_v20  ;;  %929 = vmatprep.subr.mxu0 %v586_v1 }
  0x50   : > { %901 = vmatprep.subr.mxu1 %v449_v21  ;;  %930 = vmatpush3.msra.mxu0 %v586_v1 }
  0x51   : > { %902 = vmatpush3.msra.mxu1 %v449_v21  ;;  %931 = vmatprep.subr.mxu0 %v585_v2 }
  0x52   : > { %903 = vmatprep.subr.mxu1 %v448_v22  ;;  %932 = vmatpush3.msra.mxu0 %v585_v2 }
  0x53   : > { %904 = vmatpush3.msra.mxu1 %v448_v22  ;;  %933 = vmatprep.subr.mxu0 %v584_v3 }
  0x54   : > { %905 = vmatprep.subr.mxu1 %v447_v23  ;;  %934 = vmatpush3.msra.mxu0 %v584_v3 }
  0x55   : > { %906 = vmatpush3.msra.mxu1 %v447_v23  ;;  %935 = vmatprep.subr.mxu0 %v583_v4 }
  0x56   : > { %936 = vmatpush3.msra.mxu0 %v583_v4 }
  0x57   : > { %937 = vmatprep.subr.mxu0 %v582_v5 }
  0x58   : > { %938 = vmatpush3.msra.mxu0 %v582_v5 }
  0x59   : > { %939 = vmatprep.subr.mxu0 %v581_v6 }
  0x5a   : > { %940 = vmatpush3.msra.mxu0 %v581_v6 }
  0x5b   : > { %941 = vmatprep.subr.mxu0 %v580_v7 }
  0x5c   : > { %942 = vmatpush3.msra.mxu0 %v580_v7 }
  0x5d   : > { %943 = vmatprep.subr.mxu0 %v579_v8 }
  0x5e   : > { %944 = vmatpush3.msra.mxu0 %v579_v8 }
  0xfc   : > { %v871_v25 = vpop.f32.mrf.mxu0 }
  0xfd   : > { %v410_v26 = vadd.f32 %v871_v25, %v800_v24 }
  0xfe   : > { %v404_v27 = vpop.f32.mrf.mxu0 }
  0xff   : > { %v424_v28 = vsub.f32 0.0, %v410_v26  ;;  %v405_v29 = vadd.f32 %v800_v24, %v404_v27 }
 0x100   : > { %v874_v30 = vpop.f32.mrf.mxu0 }
 0x101   : > { %v429_v31 = vmul.f32 1.442695, %v424_v28  ;;  %v423_v32 = vsub.f32 0.0, %v405_v29  ;;  %v420_v33 = vadd.f32 %v874_v30, %v800_v24 }
 0x102   : > { %v414_v34 = vpop.f32.mrf.mxu0 }
 0x103   : > { %1015 = vpow2.f32 %v429_v31  ;;  %v427_v35 = vmul.f32 1.442695, %v423_v32  ;;  %v426_v36 = vsub.f32 0.0, %v420_v33  ;;  %v415_v37 = vadd.f32 %v800_v24, %v414_v34 }
 0x105   : > { %1017 = vpow2.f32 %v427_v35  ;;  %v433_v38 = vmul.f32 1.442695, %v426_v36  ;;  %v425_v39 = vsub.f32 0.0, %v415_v37 }
 0x107   : > { %1019 = vpow2.f32 %v433_v38  ;;  %v431_v40 = vmul.f32 1.442695, %v425_v39 }
 0x109   : > { %1021 = vpow2.f32 %v431_v40 }
 0x110   : > { %v1016_v41 = vpop.eup %1015 }
 0x111   : > { %v436_v42 = vadd.f32 1.0, %v1016_v41 }
 0x112   : > { %v1018_v43 = vpop.eup %1017 }
 0x113   : > { %v435_v44 = vadd.f32 1.0, %v1018_v43  ;;  %1023 = vrcp.f32 %v436_v42  ;;  %v806_v42 = vld [vmem:[%s1389_s6] ss:$0 sm:$0xff] }
 0x114   : > { %v1020_v45 = vpop.eup %1019 }
 0x115   : > { %1025 = vrcp.f32 %v435_v44  ;;  %v438_v46 = vadd.f32 1.0, %v1020_v45 }
 0x116   : > { %v1022_v47 = vpop.eup %1021 }
 0x117   : > { %v437_v48 = vadd.f32 1.0, %v1022_v47  ;;  %1027 = vrcp.f32 %v438_v46 }
 0x119   : > { %1029 = vrcp.f32 %v437_v48 }
 0x120   : > { %v1024_v49 = vpop.eup %1023 }
 0x121   : > { %v444_v52 = vmul.f32 %v1024_v49, %v410_v26 }
 0x122   : > { %v1026_v50 = vpop.eup %1025 }
 0x123   : > { %v443_v51 = vmul.f32 %v1026_v50, %v405_v29 }
 0x124   : > { %v1028_v53 = vpop.eup %1027 }
 0x125   : > { %907 = vmatprep.mubr.f32.mxu1 %v443_v51  ;;  %v446_v56 = vmul.f32 %v1028_v53, %v420_v33 }
 0x126   : > { %v1030_v54 = vpop.eup %1029  ;;  %908 = vmatmul.mubr.f32.vlgmr.msra.gmra.mxu1 %v444_v52 }
 0x127   : > { %v445_v55 = vmul.f32 %v1030_v54, %v415_v37 }
 0x129   : > { %910 = vmatprep.mubr.f32.mxu1 %v445_v55 }
 0x12a   : > { %911 = vmatmul.mubr.f32.gmra.mxu1 %v446_v56 }
 0x1e6   : > { %v909_v10 = vpop.f32.mrf.mxu1 }
 0x1e7   : > { %v542_v11 = vadd.f32 %v909_v10, %v805_v9 }
 0x1e8   : > { %v536_v12 = vpop.f32.mrf.mxu1 }
 0x1e9   : > { %v556_v13 = vsub.f32 0.0, %v542_v11  ;;  %v537_v14 = vadd.f32 %v805_v9, %v536_v12 }
 0x1ea   : > { %v912_v15 = vpop.f32.mrf.mxu1 }
 0x1eb   : > { %v561_v16 = vmul.f32 1.442695, %v556_v13  ;;  %v555_v17 = vsub.f32 0.0, %v537_v14  ;;  %v552_v18 = vadd.f32 %v912_v15, %v805_v9 }
 0x1ec   : > { %v546_v19 = vpop.f32.mrf.mxu1 }
 0x1ed   : > { %1031 = vpow2.f32 %v561_v16  ;;  %v559_v20 = vmul.f32 1.442695, %v555_v17  ;;  %v558_v21 = vsub.f32 0.0, %v552_v18  ;;  %v547_v22 = vadd.f32 %v805_v9, %v546_v19 }
 0x1ef   : > { %1033 = vpow2.f32 %v559_v20  ;;  %v565_v23 = vmul.f32 1.442695, %v558_v21  ;;  %v557_v24 = vsub.f32 0.0, %v547_v22 }
 0x1f1   : > { %1035 = vpow2.f32 %v565_v23  ;;  %v563_v25 = vmul.f32 1.442695, %v557_v24 }
 0x1f3   : > { %1037 = vpow2.f32 %v563_v25 }
 0x1fa   : > { %v1032_v26 = vpop.eup %1031 }
 0x1fb   : > { %v568_v27 = vadd.f32 1.0, %v1032_v26 }
 0x1fc   : > { %v1034_v28 = vpop.eup %1033 }
 0x1fd   : > { %v567_v29 = vadd.f32 1.0, %v1034_v28  ;;  %1039 = vrcp.f32 %v568_v27 }
 0x1fe   : > { %v1036_v30 = vpop.eup %1035 }
 0x1ff   : > { %1041 = vrcp.f32 %v567_v29  ;;  %v570_v31 = vadd.f32 1.0, %v1036_v30 }
 0x200   : > { %v1038_v32 = vpop.eup %1037 }
 0x201   : > { %v569_v33 = vadd.f32 1.0, %v1038_v32  ;;  %1043 = vrcp.f32 %v570_v31 }
 0x203   : > { %1045 = vrcp.f32 %v569_v33 }
 0x20a   : > { %v1040_v34 = vpop.eup %1039 }
 0x20b   : > { %v576_v37 = vmul.f32 %v1040_v34, %v542_v11 }
 0x20c   : > { %v1042_v35 = vpop.eup %1041 }
 0x20d   : > { %v575_v36 = vmul.f32 %v1042_v35, %v537_v14 }
 0x20e   : > { %v1044_v38 = vpop.eup %1043 }
 0x20f   : > { %945 = vmatprep.mubr.f32.mxu0 %v575_v36  ;;  %v578_v41 = vmul.f32 %v1044_v38, %v552_v18 }
 0x210   : > { %v1046_v39 = vpop.eup %1045  ;;  %946 = vmatmul.mubr.f32.vlgmr.msra.gmra.mxu0 %v576_v37 }
 0x211   : > { %v577_v40 = vmul.f32 %v1046_v39, %v547_v22 }
 0x213   : > { %948 = vmatprep.mubr.f32.mxu0 %v577_v40 }
 0x214   : > { %949 = vmatmul.mubr.f32.gmra.mxu0 %v578_v41 }
 0x2d0   : > { %v947_v43 = vpop.f32.mrf.mxu0 }
 0x2d1   : > { %v674_v44 = vadd.f32 %v947_v43, %v806_v42 }
 0x2d2   : > { %v668_v45 = vpop.f32.mrf.mxu0 }
 0x2d3   : > { %688 = vst [vmem:[%s302_s20 + $0x8] sm:$0xff] %v674_v44  ;;  %v669_v46 = vadd.f32 %v806_v42, %v668_v45 }
 0x2d4   : > { %v950_v47 = vpop.f32.mrf.mxu0 }
 0x2d5   : > { %687 = vst [vmem:[%s302_s20] sm:$0xff] %v669_v46  ;;  %v684_v48 = vadd.f32 %v950_v47, %v806_v42 }
 0x2d6   : > { %v678_v49 = vpop.f32.mrf.mxu0 }
 0x2d7   : > { %690 = vst [vmem:[%s302_s20 + $0x18] sm:$0xff] %v684_v48  ;;  %v679_v50 = vadd.f32 %v806_v42, %v678_v49 }
 0x2d9   : > { %689 = vst [vmem:[%s302_s20 + $0x10] sm:$0xff] %v679_v50 }
 0x2da   : > { %1112 = shalt.err (!%p1109_p3)
}
 0x2db   : > { %s1113_s13 = scalar_lea.hbm %s1341_s8, 512  ;;  %s1117_s19 = scalar_lea.hbm %s1390_s7, 1024 }
 0x2dc   : > { %p1114_p2 = scmp.ne.s32.totalorder %s1341_s8, %s1113_s13  ;;  %p1118_p7 = scmp.lt.s32.totalorder %s1341_s8, %s1390_s7 }
 0x2dd   : > { %p1119_p6 = scmp.lt.s32.totalorder %s1117_s19, %s1113_s13 }
 0x2de   : > { %p1115_p4 = pnand %p1114_p2, %p1254_p5 }
 0x2df   : > { %p1120_p9 = por %p1119_p6, %p1118_p7 }
 0x2e0   : > { %p1116_p13 = pneg %p1115_p4 }
 0x2e2   : > { %p1121_p10 = pnand %p1120_p9, %p1116_p13 }
 0x2e4   : > { %1124 = shalt.err (!%p1121_p10)
}
 0x2e5   : > { %s1174_s23 = smov 128   ;;  %s1175_s29 = smov 8  }
 0x2e6   : > { %959 = dma.vmem_to_hbm [thread:$0]  (%p1254_p5), %s1336_s21, 512, %s1341_s8, %s1343_s9, %s1174_s23, %s1174_s23, %s1175_s29  }
 0x2e7 PF: > { %p976_p12 = scmp.ge.s32.totalorder %s1167_s27, 2  ;;  %s720_s28 = sand.u32 1, %s1155_s24  }
 0x2e8   : > { %p1400_p8 = scmp.ne.s32.totalorder %s1393_s12, 0  ;;  %s721_s14 = scalar_lea.sflag [#allocation4], %s720_s28 }
 0x2ea   : > { %p969_p11 = pnand %p976_p12, %p1400_p8 }
 0x2ec   : > { %p970_p0 = pneg %p969_p11 }
 0x2ee   : > { %1150 = dma.done.wait (%p970_p0), %s721_s14, 512  }
 0x2ef   : > { %1152 = vsyncadd (%p970_p0), %s721_s14, 4294966784  ;;  %p19_p1 = scmp.ge.s32.totalorder %s1241_s30, 4   ;;  %s1401_s24 = smov %s1159_s25 }
 0x2f0   : > { %s1402_s25 = smov %s1163_s26  ;;  %s1403_s26 = smov %s1252_s10 }
 0x2f1   : > { %s1404_s27 = smov %s1241_s30  ;;  %21 = sbr.rel (!%p19_p1) target bundleno = 5 (0x5), region = 92 }
 0x2f6   :  { %726 = vsyncpa [#allocation3], 1 }
 0x2f7   :  { %728 = vsyncpa [#allocation3 + $0x1], 1 }
 0x2f8   :  { %729 = vsyncpa [#allocation6], 1 }
 0x2f9   :  { %730 = vsyncpa [#allocation4], 1 }
 0x2fa   :  { %732 = vsyncpa [#allocation4 + $0x1], 1 }

</bundles_post_ra>
